<compile_context>
chip_gen: v6e
topology: v6e:2x2x1
jax: 0.10.0
libtpu: 0.0.40
codegen_flags: <defaults>
</compile_context>

<pallas_src>
import jax
import jax.numpy as jnp
import numpy as np
from jax.experimental import pallas as pl
from jax.experimental.pallas import tpu as pltpu


IN_DIM = 128
HID_DIM = 32
OUT_DIM = 6
OUT_PAD = 128          # lane-dense padded output width
TB_MAX = 4096          # batch tile cap; double-buffered footprint ~6 MiB (v5e-safe)


# ------------------------------ fused MLP kernel ----------------------------- #

def mlp_kernel(x_ref, w1_ref, b1_ref, w2_ref, b2_ref, out_ref):
    # fc1: bf16 x bf16 -> f32 accumulation on the MXU; bias + ReLU in f32 (VPU).
    h = jnp.dot(x_ref[...], w1_ref[...],
                preferred_element_type=jnp.float32) + b1_ref[...]     # (tb, 32)
    h = jnp.maximum(h, 0.0)
    # fc2 over the 128-padded output columns; single unmasked lane-dense store.
    out_ref[...] = jnp.dot(h.astype(jnp.bfloat16), w2_ref[...],
                           preferred_element_type=jnp.float32) + b2_ref[...]


# ------------------------------ tiling helpers -------------------------------- #

def _round_up(n, m):
    return ((n + m - 1) // m) * m


def _pick_block_b(batch):
    # Fixed, sublane-aligned tile: at most TB_MAX rows, at most ~half the batch
    # (so v7x's 2 TensorCores both get grid steps at large B), never < 8 and
    # always a multiple of 8 so ragged last blocks stay (8,128)-aligned and
    # Pallas masks the tail.
    half = _round_up(pl.cdiv(batch, 2), 8)
    return max(8, min(TB_MAX, half))


# ------------------------------ forward wrapper ------------------------------ #

def prepare_params(params_f32):
    """Cast weights to bf16, keep biases f32, zero-pad fc2 to 128 lanes."""
    w1 = params_f32["w1"].astype(jnp.bfloat16)                        # (128, 32)
    b1 = params_f32["b1"].astype(jnp.float32)                         # (1, 32)
    w2 = jnp.zeros((HID_DIM, OUT_PAD), jnp.bfloat16).at[:, :OUT_DIM].set(
        params_f32["w2"].astype(jnp.bfloat16))                        # (32, 128)
    b2 = jnp.zeros((1, OUT_PAD), jnp.float32).at[:, :OUT_DIM].set(
        params_f32["b2"].astype(jnp.float32))                         # (1, 128)
    return {"w1": w1, "b1": b1, "w2": w2, "b2": b2}


@jax.jit
def classification_forward(x, params):
    """x: (B, 128) float32 -> (B, 6) float32."""
    B = x.shape[0]
    tb = _pick_block_b(B)
    x16 = x.astype(jnp.bfloat16)
    out_full = pl.pallas_call(
        mlp_kernel,
        out_shape=jax.ShapeDtypeStruct((B, OUT_PAD), jnp.float32),
        grid=(pl.cdiv(B, tb),),
        in_specs=[
            pl.BlockSpec((tb, IN_DIM), lambda i: (i, 0)),          # x tile (bf16)
            pl.BlockSpec((IN_DIM, HID_DIM), lambda i: (0, 0)),     # W1 (resident)
            pl.BlockSpec((1, HID_DIM), lambda i: (0, 0)),          # b1
            pl.BlockSpec((HID_DIM, OUT_PAD), lambda i: (0, 0)),    # W2 padded
            pl.BlockSpec((1, OUT_PAD), lambda i: (0, 0)),          # b2 padded
        ],
        out_specs=pl.BlockSpec((tb, OUT_PAD), lambda i: (i, 0)),   # lane-dense out
        compiler_params=pltpu.CompilerParams(
            dimension_semantics=("parallel",)),                    # v7x megacore
    )(x16, params["w1"], params["b1"], params["w2"], params["b2"])
    return out_full[:, :OUT_DIM]


# ------------------------------ pure-JAX references --------------------------- #

def reference_forward_bf16(x, params_f32):
    """Same numerics as the kernel (bf16 operands, f32 accumulation)."""
    xb = x.astype(jnp.bfloat16)
    w1 = params_f32["w1"].astype(jnp.bfloat16)
    w2 = params_f32["w2"].astype(jnp.bfloat16)
    h = jnp.maximum(
        jnp.dot(xb, w1, preferred_element_type=jnp.float32) + params_f32["b1"], 0.0)
    return (jnp.dot(h.astype(jnp.bfloat16), w2, preferred_element_type=jnp.float32)
            + params_f32["b2"])


def reference_forward_f32(x, params_f32):
    h = jnp.maximum(x @ params_f32["w1"] + params_f32["b1"], 0.0)
    return h @ params_f32["w2"] + params_f32["b2"]


# ----------------------------------- main ------------------------------------ #

if __name__ == "__main__":
    B = 2                       # small batch; feature dims fixed by the module

    key = jax.random.PRNGKey(0)
    k_x, k_w1, k_b1, k_w2, k_b2 = jax.random.split(key, 5)

    def init(k, shape, scale=0.1):
        return scale * jax.random.normal(k, shape, jnp.float32)

    # stored pre-transposed: y = x @ W + b (torch weight is (out, in))
    params_f32 = {
        "w1": init(k_w1, (IN_DIM, HID_DIM)),
        "b1": init(k_b1, (1, HID_DIM)),
        "w2": init(k_w2, (HID_DIM, OUT_DIM)),
        "b2": init(k_b2, (1, OUT_DIM)),
    }
    params = prepare_params(params_f32)

    x = jax.random.normal(k_x, (B, IN_DIM), jnp.float32)

    out = classification_forward(x, params)
    out = jax.block_until_ready(out)
    assert out.shape == (B, OUT_DIM)

    # Exact-path check: reference with the same bf16-operand / f32-accumulate math.
    ref_bf16 = reference_forward_bf16(x, params_f32)
    np.testing.assert_allclose(np.asarray(out), np.asarray(ref_bf16),
                               rtol=1e-4, atol=1e-4)

    # Module-semantics check vs. full-f32 math (loose: bf16 operand rounding).
    ref_f32 = reference_forward_f32(x, params_f32)
    np.testing.assert_allclose(np.asarray(out), np.asarray(ref_f32),
                               rtol=5e-2, atol=5e-2)

    print("KERNEL_OK")
</pallas_src>

<mosaic_0001>
module attributes {stable_mosaic.version = 11 : i64} {
  func.func @mlp_kernel(%arg0: i32, %arg1: memref<8x128xbf16, #tpu.memory_space<vmem>>, %arg2: memref<128x32xbf16, #tpu.memory_space<vmem>>, %arg3: memref<1x32xf32, #tpu.memory_space<vmem>>, %arg4: memref<32x128xbf16, #tpu.memory_space<vmem>>, %arg5: memref<1x128xf32, #tpu.memory_space<vmem>>, %arg6: memref<8x128xf32, #tpu.memory_space<vmem>>) attributes {dimension_semantics = [#tpu.dimension_semantics<parallel>], iteration_bounds = array<i64: 1>, scalar_prefetch = 0 : i64, scratch_operands = 0 : i64, tpu.core_type = #tpu.core_type<tc>, window_params = [{transform_indices = @transform_0, window_bounds = array<i64: 8, 128>}, {pipeline_mode = #tpu.pipeline_mode<synchronous>, transform_indices = @transform_1, window_bounds = array<i64: 128, 32>}, {pipeline_mode = #tpu.pipeline_mode<synchronous>, transform_indices = @transform_2, window_bounds = array<i64: 1, 32>}, {pipeline_mode = #tpu.pipeline_mode<synchronous>, transform_indices = @transform_3, window_bounds = array<i64: 32, 128>}, {pipeline_mode = #tpu.pipeline_mode<synchronous>, transform_indices = @transform_4, window_bounds = array<i64: 1, 128>}, {transform_indices = @transform_5, window_bounds = array<i64: 8, 128>}]} {
    %c0 = arith.constant 0 : index
    %c0_0 = arith.constant 0 : index
    %0 = vector.load %arg1[%c0, %c0_0] : memref<8x128xbf16, #tpu.memory_space<vmem>>, vector<8x128xbf16>
    %c0_1 = arith.constant 0 : index
    %c0_2 = arith.constant 0 : index
    %1 = vector.load %arg2[%c0_1, %c0_2] : memref<128x32xbf16, #tpu.memory_space<vmem>>, vector<128x32xbf16>
    %cst = arith.constant dense<0.000000e+00> : vector<8x32xf32>
    %2 = tpu.matmul %0, %1, %cst {dimension_numbers = #tpu.dot_dimension_numbers<[1], [0], [0], [1], [0, 0, 1, 1], [], []>} : vector<8x128xbf16>, vector<128x32xbf16>, vector<8x32xf32> -> vector<8x32xf32>
    %c0_3 = arith.constant 0 : index
    %c0_4 = arith.constant 0 : index
    %3 = vector.load %arg3[%c0_3, %c0_4] : memref<1x32xf32, #tpu.memory_space<vmem>>, vector<1x32xf32>
    %4 = vector.broadcast %3 : vector<1x32xf32> to vector<8x32xf32>
    %5 = arith.addf %2, %4 : vector<8x32xf32>
    %cst_5 = arith.constant 0.000000e+00 : f32
    %6 = vector.broadcast %cst_5 : f32 to vector<8x32xf32>
    %7 = arith.maximumf %5, %6 : vector<8x32xf32>
    %8 = arith.truncf %7 : vector<8x32xf32> to vector<8x32xbf16>
    %c0_6 = arith.constant 0 : index
    %c0_7 = arith.constant 0 : index
    %9 = vector.load %arg4[%c0_6, %c0_7] : memref<32x128xbf16, #tpu.memory_space<vmem>>, vector<32x128xbf16>
    %cst_8 = arith.constant dense<0.000000e+00> : vector<8x128xf32>
    %10 = tpu.matmul %8, %9, %cst_8 {dimension_numbers = #tpu.dot_dimension_numbers<[1], [0], [0], [1], [0, 0, 1, 1], [], []>} : vector<8x32xbf16>, vector<32x128xbf16>, vector<8x128xf32> -> vector<8x128xf32>
    %c0_9 = arith.constant 0 : index
    %c0_10 = arith.constant 0 : index
    %11 = vector.load %arg5[%c0_9, %c0_10] : memref<1x128xf32, #tpu.memory_space<vmem>>, vector<1x128xf32>
    %12 = vector.broadcast %11 : vector<1x128xf32> to vector<8x128xf32>
    %13 = arith.addf %10, %12 : vector<8x128xf32>
    %c0_11 = arith.constant 0 : index
    %c0_12 = arith.constant 0 : index
    %14 = vector.load %arg6[%c0_11, %c0_12] : memref<8x128xf32, #tpu.memory_space<vmem>>, vector<8x128xf32>
    tpu.vector_store %arg6[%c0_11, %c0_12], %13 {strides = array<i32>} : memref<8x128xf32, #tpu.memory_space<vmem>>, vector<8x128xf32>,
    return
  }
  func.func @transform_0(%arg0: i32) -> (i32, i32) {
    %c0_i32 = arith.constant 0 : i32
    %c0_i32_0 = arith.constant 0 : i32
    return %arg0, %c0_i32 : i32, i32
  }
  func.func @transform_1(%arg0: i32) -> (i32, i32) {
    %c0_i32 = arith.constant 0 : i32
    %c0_i32_0 = arith.constant 0 : i32
    %c0_i32_1 = arith.constant 0 : i32
    return %c0_i32, %c0_i32_0 : i32, i32
  }
  func.func @transform_2(%arg0: i32) -> (i32, i32) {
    %c0_i32 = arith.constant 0 : i32
    %c0_i32_0 = arith.constant 0 : i32
    %c0_i32_1 = arith.constant 0 : i32
    return %c0_i32, %c0_i32_0 : i32, i32
  }
  func.func @transform_3(%arg0: i32) -> (i32, i32) {
    %c0_i32 = arith.constant 0 : i32
    %c0_i32_0 = arith.constant 0 : i32
    %c0_i32_1 = arith.constant 0 : i32
    return %c0_i32, %c0_i32_0 : i32, i32
  }
  func.func @transform_4(%arg0: i32) -> (i32, i32) {
    %c0_i32 = arith.constant 0 : i32
    %c0_i32_0 = arith.constant 0 : i32
    %c0_i32_1 = arith.constant 0 : i32
    return %c0_i32, %c0_i32_0 : i32, i32
  }
  func.func @transform_5(%arg0: i32) -> (i32, i32) {
    %c0_i32 = arith.constant 0 : i32
    %c0_i32_0 = arith.constant 0 : i32
    return %arg0, %c0_i32 : i32, i32
  }
}

</mosaic_0001>

<bundles_post_ra>
// kernel: classification_forward.1
= control target key start
LH: loop header
LB: loop body
LE: loop exit
PB: predicated region body
PF: predicated region fallthrough
CT: control target
= control target key end

     0   :  { %10 = vsyncpa [#allocation3], 0  ;;  %v343_v1 = vmov 0.0   ;;  %vm344_vm0 = vmmov 0   ;;  %v58_v4 = vlaneseq  ;;  %v345_v6 = vmov 1966171168   ;;  %s430_s0 = inlined_call_operand.vmem [shape: bf16[2,128], index: 0, kind: input, shape index: {}]   ;;  %s431_s1 = inlined_call_operand.vmem [shape: bf16[128,32], index: 1, kind: input, shape index: {}]   ;;  %s432_s2 = inlined_call_operand.vmem [shape: f32[1,32], index: 2, kind: input, shape index: {}]   ;;  %s433_s3 = inlined_call_operand.vmem [shape: bf16[32,128], index: 3, kind: input, shape index: {}]   ;;  %s434_s4 = inlined_call_operand.vmem [shape: f32[1,128], index: 4, kind: input, shape index: {}]   ;;  %s435_s5 = inlined_call_operand.hbm [shape: f32[2,128], index: 5, kind: output, shape index: {}]  }
   0x1   :  { %v311_v0 = vld [vmem:[%s431_s1 + $0x38] sm:$0xff]   ;;  %277 = vmatprep.subr.bf16.mxu0 %v343_v1  ;;  %297 = vmatprep.subr.bf16.mxu1 %v343_v1  ;;  %v312_v2 = vld [vmem:[%s431_s1 + $0x30] sm:$0xff]   ;;  %v313_v3 = vld [vmem:[%s431_s1 + $0x28] sm:$0xff]   ;;  %v56_v7 = vunpack.c.l.s4 %v345_v6  ;;  %vm191_vm1 = vcmask 261120  }
   0x2   :  { %278 = vmatpush3.bf16.msra.mxu0 %v311_v0  ;;  %293 = vmatprep.mubr.msk.bf16.mxu0 %vm344_vm0, %v343_v1  ;;  %v314_v5 = vld [vmem:[%s431_s1 + $0x20] sm:$0xff]   ;;  %v315_v8 = vld [vmem:[%s431_s1 + $0x18] sm:$0xff]   ;;  %v59_v11 = vshrl.u32 %v58_v4, 7  ;;  %v316_v18 = vld [vmem:[%s431_s1 + $0x10] sm:$0xff]  }
   0x3   :  { %279 = vmatprep.subr.bf16.mxu0 %v343_v1  ;;  %301 = vmatprep.mubr.msk.bf16.mxu1 %vm344_vm0, %v343_v1  ;;  %v22_v9 = vld [vmem:[%s430_s0] sm:$0x1]  ;;  %v57_v10 = vunpack.c.0.s8 %v56_v7  ;;  %v23_v12 = vld [vmem:[%s430_s0 + $0x1] sm:$0x1]  ;;  %v24_v13 = vld [vmem:[%s430_s0 + $0x2] sm:$0x1] }
   0x4   :  { %v25_v14 = vld [vmem:[%s430_s0 + $0x3] sm:$0x1]  ;;  %v53_v15 = vcombine.low %v22_v9, %v23_v12  ;;  %v317_v21 = vld [vmem:[%s431_s1 + $0x8] sm:$0xff]   ;;  %v252_v27 = vld [vmem:[%s432_s2] ss:$0 sm:$0xff] }
   0x5   :  { %v54_v16 = vcombine.low %v24_v13, %v25_v14  ;;  %v60_v17 = vsub.s32 %v57_v10, %v59_v11  ;;  %v318_v23 = vld [vmem:[%s431_s1] sm:$0xff]   ;;  %v319_v25 = vld [vmem:[%s433_s3 + $0x8] sm:$0xff]  }
   0x6   :  { %280 = vmatpush3.bf16.msra.mxu0 %v312_v2  ;;  %298 = vmatpush3.bf16.msra.mxu1 %v319_v25  ;;  %v320_v26 = vld [vmem:[%s433_s3] sm:$0xff]  }
   0x7   :  { %281 = vmatprep.subr.bf16.mxu0 %v343_v1  ;;  %v61_v19 = vrot.slane %v53_v15, %v60_v17  ;;  %v68_v20 = vrot.slane %v54_v16, %v60_v17  ;;  %299 = vmatprep.subr.bf16.mxu1 %v343_v1  ;;  %v261_v35 = vld [vmem:[%s434_s4] ss:$0 sm:$0xff] }
   0x9   :  { %v69_v22 = vcombine.low %v61_v19, %v68_v20 }
   0xa   :  { %282 = vmatpush3.bf16.msra.mxu0 %v313_v3  ;;  %300 = vmatpush3.bf16.msra.mxu1 %v320_v26 }
   0xb   :  { %283 = vmatprep.subr.bf16.mxu0 %v343_v1  ;;  %v76_v24 = vrot.slane %v69_v22, %v60_v17 }
   0xe   :  { %284 = vmatpush3.bf16.msra.mxu0 %v314_v5 }
   0xf   :  { %285 = vmatprep.subr.bf16.mxu0 %v343_v1 }
  0x12   :  { %286 = vmatpush3.bf16.msra.mxu0 %v315_v8 }
  0x13   :  { %287 = vmatprep.subr.bf16.mxu0 %v343_v1 }
  0x16   :  { %288 = vmatpush3.bf16.msra.mxu0 %v316_v18 }
  0x17   :  { %289 = vmatprep.subr.bf16.mxu0 %v343_v1 }
  0x1a   :  { %290 = vmatpush3.bf16.msra.mxu0 %v317_v21 }
  0x1b   :  { %291 = vmatprep.subr.bf16.mxu0 %v343_v1 }
  0x1e   :  { %292 = vmatpush3.bf16.msra.mxu0 %v318_v23 }
  0x21   :  { %294 = vmatmul.mubr.bf16.vlgmr.msra.gmra.mxu0 %v76_v24 }
  0xe1   :  { %v160_v28 = vpop.f32.mrf.mxu0 }
  0xe2   :  { %v161_v29 = vadd.f32 %v252_v27, %v160_v28 }
  0xe3   :  { %v295_v30 = vpop.f32.mrf.mxu0 }
  0xe4   :  { %v166_v31 = vmax.f32 %v161_v29, 0.0 }
  0xe5   :  { %v163_v32 = vpop.f32.mrf.mxu0 }
  0xe6   :  { %v167_v33 = vpack.c.bf16 %v166_v31, %v166_v31 }
  0xe7   :  { %v296_v34 = vpop.f32.mrf.mxu0 }
  0xe8   :  { %302 = vmatmul.mubr.msk.bf16.vlgmr.msra.gmra.mxu1 %vm191_vm1, %v167_v33 }
 0x1a8   :  { %v229_v36 = vpop.f32.mrf.mxu1 }
 0x1a9   :  { %v230_v37 = vadd.f32 %v261_v35, %v229_v36 }
 0x1aa   :  { %v303_v38 = vpop.f32.mrf.mxu1 }
 0x1ab   :  { %235 = vst [vmem:[#allocation2] sm:$0xff] %v230_v37 }
 0x1ac   :  { %v232_v39 = vpop.f32.mrf.mxu1 }
 0x1ae   :  { %v304_v40 = vpop.f32.mrf.mxu1 }
 0x1af   :  { %240 = vsyncadd [#allocation3], 96  ;;  %s346_s2 = smov [#allocation2]  }
 0x1b0   :  { %s241_s3 = sshll.u32 %s346_s2, 4  ;;  %s242_s3 = int_to_ptr.vmem [resolvable:$true] %s241_s3 }
 0x1b1   :  { %s321_s23 = scalar_lea.vmem %s242_s3, 32  ;;  %s325_s24 = scalar_lea.vmem %s242_s3, 128 }
 0x1b2   :  { %p322_p0 = scmp.ne.s32.totalorder %s242_s3, %s321_s23  ;;  %p326_p1 = scmp.lt.s32.totalorder %s242_s3, %s242_s3 }
 0x1b3   :  { %p327_p2 = scmp.lt.s32.totalorder %s325_s24, %s321_s23 }
 0x1b5   :  { %p328_p3 = por %p327_p2, %p326_p1 }
 0x1b7   :  { %p329_p4 = pnand %p328_p3, %p322_p0 }
 0x1b9   :  { %332 = shalt.err (!%p329_p4)
}
 0x1ba   :  { %s347_s25 = smov 32   ;;  %s348_s4 = smov 2  }
 0x1bb   :  { %247 = dma.vmem_to_hbm [thread:$0]  %s242_s3, 32, %s435_s5, [#allocation3], %s347_s25, %s347_s25, %s348_s4  }
 0x1bc   :  { %341 = dma.done.wait [#allocation3], 128  }
 0x1bd   :  { %342 = vsyncadd [#allocation3], 4294967168 }
 0x1be   :  { %251 = vsyncpa [#allocation3], 1 }

</bundles_post_ra>
